<compile_context>
chip_gen: v6e
topology: v6e:2x2x1
jax: 0.10.0
libtpu: 0.0.40
codegen_flags: <defaults>
</compile_context>

<pallas_src>
import functools
import math

import jax
import jax.numpy as jnp
from jax.experimental import pallas as pl
from jax.experimental.pallas import tpu as pltpu


# ---------------------------------------------------------------------------
# Small helpers (built only from ops with guaranteed Mosaic lowerings).
# ---------------------------------------------------------------------------
def _layernorm(x, w, b, eps=1e-5):
    mu = jnp.mean(x, axis=-1, keepdims=True)
    var = jnp.mean((x - mu) ** 2, axis=-1, keepdims=True)
    return (x - mu) * jax.lax.rsqrt(var + eps) * w + b


def _erf_approx(x):
    # Abramowitz & Stegun 7.1.26, max abs err ~1.5e-7.  Avoids relying on a
    # math.erf lowering inside Mosaic.
    a1, a2, a3, a4, a5 = 0.254829592, -0.284496736, 1.421413741, -1.453152027, 1.061405429
    p = 0.3275911
    sign = jnp.where(x >= 0.0, 1.0, -1.0)
    ax = jnp.abs(x)
    t = 1.0 / (1.0 + p * ax)
    poly = ((((a5 * t + a4) * t + a3) * t + a2) * t + a1) * t
    return sign * (1.0 - poly * jnp.exp(-ax * ax))


def _gelu(x, exact):
    if exact:
        # TODO(synk): switch to jax.lax.erf once math.erf lowering is guaranteed.
        return 0.5 * x * (1.0 + _erf_approx(x * (1.0 / math.sqrt(2.0))))
    c = math.sqrt(2.0 / math.pi)
    return 0.5 * x * (1.0 + jnp.tanh(c * (x + 0.044715 * x * x * x)))


# ---------------------------------------------------------------------------
# Fused decoder-stack kernel: one grid step = (batch tile, layer).
# ---------------------------------------------------------------------------
def decoder_stack_kernel(x_ref, pos_ref, vecc_ref, qkv_w_ref, proj_w_ref,
                         fc1_w_ref, fc1_b_ref, fc2_w_ref, norm_ref,
                         o_ref, x_res,
                         *, num_heads, tokens_per_batch, return_token_num,
                         matmul_dtype, exact_gelu, approx_recip):
    l = pl.program_id(1)
    depth = pl.num_programs(1)

    # First layer of this batch tile: load activations into the resident scratch.
    @pl.when(l == 0)
    def _():
        x_res[...] = x_ref[...].astype(jnp.float32)

    rows, C = x_res.shape
    N = tokens_per_batch
    Bt = rows // N
    nh = num_heads
    hd = C // nh
    R = return_token_num

    # Packed per-layer vectors: [ln1_w, ln1_b, proj_b, ln2_w, ln2_b, fc2_b].
    vc = vecc_ref[0]                                     # (6, C) f32
    ln1_w, ln1_b = vc[0:1], vc[1:2]
    proj_b = vc[2:3]
    ln2_w, ln2_b = vc[3:4], vc[4:5]
    fc2_b = vc[5:6]
    fc1_b = fc1_b_ref[0]                                 # (1, H) f32

    # pos is re-added every layer: x = block(x + pos).
    x = x_res[...] + pos_ref[...].astype(jnp.float32)    # (rows, C) f32

    # ---------------- attention branch ----------------
    h = _layernorm(x, ln1_w, ln1_b)
    # 1/sqrt(hd) is already folded into the q columns of qkv_w (host side).
    qkv = jnp.dot(h.astype(matmul_dtype), qkv_w_ref[0],
                  preferred_element_type=jnp.float32)    # (rows, 3C) f32
    qkv = qkv.astype(matmul_dtype)                       # single down-cast

    # Head regroup: nh lane-slices + leading-axis concat -> (G, N, hd),
    # G = nh * Bt (g = head * Bt + batch).  No per-(batch, head) Python loop.
    q_parts, k_parts, v_parts = [], [], []
    for hh in range(nh):
        c0 = hh * hd
        q_parts.append(qkv[:, c0:c0 + hd].reshape(Bt, N, hd))
        k_parts.append(qkv[:, C + c0:C + c0 + hd].reshape(Bt, N, hd))
        v_parts.append(qkv[:, 2 * C + c0:2 * C + c0 + hd].reshape(Bt, N, hd))
    qg = jnp.concatenate(q_parts, axis=0)                # (G, N, hd)
    kg = jnp.concatenate(k_parts, axis=0)
    vg = jnp.concatenate(v_parts, axis=0)

    s = jnp.einsum('gnd,gmd->gnm', qg, kg,
                   preferred_element_type=jnp.float32)   # (G, N, N) f32
    s = s - jnp.max(s, axis=-1, keepdims=True)
    p = jnp.exp(s)
    denom = jnp.sum(p, axis=-1, keepdims=True)
    if approx_recip:
        p = p * pl.reciprocal(denom, approx=True)        # EUP slot (fast path)
    else:
        p = p / denom                                    # exact (f32 path)
    og = jnp.einsum('gnm,gmd->gnd', p.astype(matmul_dtype), vg,
                    preferred_element_type=jnp.float32).astype(matmul_dtype)

    # Fold heads back onto lanes (head-major, matching the PyTorch reshape),
    # then a single tall proj GEMM.
    attn = jnp.concatenate(
        [og[hh * Bt:(hh + 1) * Bt].reshape(rows, hd) for hh in range(nh)],
        axis=-1)                                         # (rows, C)
    attn = jnp.dot(attn, proj_w_ref[0],
                   preferred_element_type=jnp.float32) + proj_b
    x = x + attn

    # ---------------- MLP branch ----------------
    h2 = _layernorm(x, ln2_w, ln2_b)
    h2 = jnp.dot(h2.astype(matmul_dtype), fc1_w_ref[0],
                 preferred_element_type=jnp.float32) + fc1_b
    h2 = _gelu(h2, exact_gelu)
    h2 = jnp.dot(h2.astype(matmul_dtype), fc2_w_ref[0],
                 preferred_element_type=jnp.float32) + fc2_b
    x = x + h2

    x_res[...] = x                                       # carry to layer l+1

    # Last layer: fused final LayerNorm on the tail tokens only, write output.
    @pl.when(l == depth - 1)
    def _():
        nw, nb = norm_ref[0:1], norm_ref[1:2]            # (1, C) each
        tail = x.reshape(Bt, N, C)[:, N - R:, :]         # (Bt, R, C)
        o_ref[...] = _layernorm(tail, nw, nb).astype(o_ref.dtype)


# ---------------------------------------------------------------------------
# Wrapper
# ---------------------------------------------------------------------------
def _tpu_vmem_bytes():
    try:
        return int(pltpu.get_tpu_info().vmem_capacity_bytes)
    except Exception:
        return 128 * 1024 * 1024


def _pick_batch_tile(B, N, max_rows):
    """Largest legal divisor of B under the row cap; prefers >= 2 batch-grid
    steps (v7x megacore).  Falls back to the SMALLEST legal tile (never B) if
    nothing fits the cap, so the VMEM budget is not silently blown."""
    legal = [bt for bt in range(1, B + 1)
             if B % bt == 0 and ((bt * N) % 8 == 0 or bt == B)]
    fitting = [bt for bt in legal if bt * N <= max_rows]
    if fitting:
        multi = [bt for bt in fitting if bt < B]
        return max(multi) if multi else max(fitting)
    return min(legal)


def transformer_decoder(x, pos, return_token_num, params, num_heads,
                        matmul_dtype=jnp.bfloat16, batch_tile=None,
                        max_rows=None, vmem_limit_bytes=None,
                        exact_gelu=None, qk_scale=None):
    B, N, C = x.shape
    depth = params["qkv_w"].shape[0]
    H = params["fc1_w"].shape[-1]
    R = int(return_token_num)
    assert C % num_heads == 0, "embed_dim must be divisible by num_heads"
    assert 1 <= R <= N

    # Chip-aware defaults: ~3/4 of physical VMEM (96 MiB cap), smaller row cap
    # on 64 MiB-VMEM chips (v7x).
    vmem_cap = _tpu_vmem_bytes()
    if vmem_limit_bytes is None:
        vmem_limit_bytes = int(min(96 * 1024 * 1024, vmem_cap * 3 // 4))
    if max_rows is None:
        max_rows = 1024 if vmem_cap >= (100 << 20) else 512

    Bt = batch_tile if batch_tile is not None else _pick_batch_tile(B, N, max_rows)
    assert B % Bt == 0
    rows = Bt * N

    if exact_gelu is None:
        exact_gelu = (matmul_dtype == jnp.float32)
    approx_recip = (matmul_dtype != jnp.float32)

    # Flatten tokens: big GEMMs see a tall M and lane-dense stores.
    x2 = x.reshape(B * N, C)
    pos2 = pos.reshape(B * N, C)

    hd = C // num_heads
    scale = qk_scale if qk_scale is not None else hd ** -0.5
    # Fold the attention scale into the q columns of qkv_w; cast MXU weights.
    qkv_w = params["qkv_w"].at[:, :, :C].multiply(scale).astype(matmul_dtype)
    proj_w = params["proj_w"].astype(matmul_dtype)
    fc1_w = params["fc1_w"].astype(matmul_dtype)
    fc2_w = params["fc2_w"].astype(matmul_dtype)

    # Pack the small per-layer vectors (fewer inputs / DMA descriptors).
    vecC = jnp.stack([params["ln1_w"], params["ln1_b"], params["proj_b"],
                      params["ln2_w"], params["ln2_b"], params["fc2_b"]],
                     axis=1).astype(jnp.float32)                 # (depth, 6, C)
    vecH = params["fc1_b"][:, None, :].astype(jnp.float32)        # (depth, 1, H)
    norm_wb = jnp.stack([params["norm_w"], params["norm_b"]],
                        axis=0).astype(jnp.float32)               # (2, C)

    tok_spec = pl.BlockSpec((rows, C), lambda i, l: (i, 0))

    def wspec(shape):  # stacked per-layer weights: depth-indexed block
        return pl.BlockSpec((1,) + shape, lambda i, l: (l, 0, 0))

    out = pl.pallas_call(
        functools.partial(decoder_stack_kernel,
                          num_heads=num_heads, tokens_per_batch=N,
                          return_token_num=R, matmul_dtype=matmul_dtype,
                          exact_gelu=exact_gelu, approx_recip=approx_recip),
        out_shape=jax.ShapeDtypeStruct((B, R, C), x.dtype),
        grid=(B // Bt, depth),
        in_specs=[
            tok_spec,                                  # x (read at l == 0)
            tok_spec,                                  # pos (re-added every layer)
            wspec((6, C)),                             # ln1_w/b, proj_b, ln2_w/b, fc2_b
            wspec((C, 3 * C)),                         # qkv_w (q cols pre-scaled)
            wspec((C, C)),                             # proj_w
            wspec((C, H)),                             # fc1_w
            wspec((1, H)),                             # fc1_b
            wspec((H, C)),                             # fc2_w
            pl.BlockSpec((2, C), lambda i, l: (0, 0)),  # final norm w/b
        ],
        out_specs=pl.BlockSpec((Bt, R, C), lambda i, l: (i, 0, 0)),
        scratch_shapes=[pltpu.VMEM((rows, C), jnp.float32)],   # resident activations
        compiler_params=pltpu.CompilerParams(
            dimension_semantics=("parallel", "arbitrary"),
            vmem_limit_bytes=vmem_limit_bytes),
    )(x2, pos2, vecC, qkv_w, proj_w, fc1_w, vecH, fc2_w, norm_wb)

    return out


# ---------------------------------------------------------------------------
# Deterministic parameter init (matches _init_weights: xavier_uniform Linear,
# zero bias; LayerNorm weight=1, bias=0), stacked over depth.
# ---------------------------------------------------------------------------
def xavier_uniform(key, out_f, in_f):
    bound = (6.0 / (in_f + out_f)) ** 0.5
    return jax.random.uniform(key, (out_f, in_f), jnp.float32, -bound, bound).T


def init_params(key, embed_dim, depth, mlp_ratio):
    C = embed_dim
    H = int(C * mlp_ratio)
    per = {k: [] for k in ("ln1_w", "ln1_b", "qkv_w", "proj_w", "proj_b",
                           "ln2_w", "ln2_b", "fc1_w", "fc1_b", "fc2_w", "fc2_b")}
    for _ in range(depth):
        key, k1, k2, k3, k4 = jax.random.split(key, 5)
        per["ln1_w"].append(jnp.ones((C,), jnp.float32))
        per["ln1_b"].append(jnp.zeros((C,), jnp.float32))
        per["qkv_w"].append(xavier_uniform(k1, 3 * C, C))      # qkv_bias=False
        per["proj_w"].append(xavier_uniform(k2, C, C))
        per["proj_b"].append(jnp.zeros((C,), jnp.float32))
        per["ln2_w"].append(jnp.ones((C,), jnp.float32))
        per["ln2_b"].append(jnp.zeros((C,), jnp.float32))
        per["fc1_w"].append(xavier_uniform(k3, H, C))
        per["fc1_b"].append(jnp.zeros((H,), jnp.float32))
        per["fc2_w"].append(xavier_uniform(k4, C, H))
        per["fc2_b"].append(jnp.zeros((C,), jnp.float32))
    params = {k: jnp.stack(v, axis=0) for k, v in per.items()}
    params["norm_w"] = jnp.ones((C,), jnp.float32)
    params["norm_b"] = jnp.zeros((C,), jnp.float32)
    return params


# ---------------------------------------------------------------------------
# Pure-JAX reference (exact erf GELU, softmax divide) for verification.
# ---------------------------------------------------------------------------
def reference(x, pos, return_token_num, params, num_heads):
    def ln(v, w, b):
        mu = jnp.mean(v, -1, keepdims=True)
        var = jnp.mean((v - mu) ** 2, -1, keepdims=True)
        return (v - mu) / jnp.sqrt(var + 1e-5) * w + b

    depth = params["qkv_w"].shape[0]
    for l in range(depth):
        h = x + pos
        B, N, C = h.shape
        hd = C // num_heads
        a_in = ln(h, params["ln1_w"][l], params["ln1_b"][l])
        qkv = a_in @ params["qkv_w"][l]
        qkv = qkv.reshape(B, N, 3, num_heads, hd).transpose(2, 0, 3, 1, 4)
        q, k, v = qkv[0], qkv[1], qkv[2]
        att = jnp.einsum("bhnd,bhmd->bhnm", q, k) * hd ** -0.5
        att = jax.nn.softmax(att, axis=-1)
        o = jnp.einsum("bhnm,bhmd->bhnd", att, v).transpose(0, 2, 1, 3).reshape(B, N, C)
        o = o @ params["proj_w"][l] + params["proj_b"][l]
        h = h + o
        m = ln(h, params["ln2_w"][l], params["ln2_b"][l])
        m = jax.nn.gelu(m @ params["fc1_w"][l] + params["fc1_b"][l], approximate=False)
        m = m @ params["fc2_w"][l] + params["fc2_b"][l]
        x = h + m
    x = x[:, -return_token_num:, :]
    return ln(x, params["norm_w"], params["norm_b"])


if __name__ == "__main__":
    B, N, C = 2, 8, 32
    num_heads = 4
    depth = 4
    mlp_ratio = 4.0
    return_token_num = 4

    key = jax.random.PRNGKey(0)
    key, kx, kp = jax.random.split(key, 3)
    x = jax.random.normal(kx, (B, N, C), jnp.float32)
    pos = jax.random.normal(kp, (B, N, C), jnp.float32)
    params = init_params(key, C, depth, mlp_ratio)

    ref = reference(x, pos, return_token_num, params, num_heads)

    # Exact path (f32 MXU, exact softmax divide, near-exact erf GELU).
    out32 = transformer_decoder(x, pos, return_token_num, params, num_heads,
                                matmul_dtype=jnp.float32)
    out32 = jax.block_until_ready(out32)
    assert out32.shape == (B, return_token_num, C)
    assert jnp.allclose(out32, ref, atol=2e-3, rtol=2e-3), "f32 path mismatch"

    # Production fast path (bf16 MXU inputs, tanh GELU, EUP approx reciprocal).
    out16 = transformer_decoder(x, pos, return_token_num, params, num_heads,
                                matmul_dtype=jnp.bfloat16)
    out16 = jax.block_until_ready(out16)
    assert out16.shape == (B, return_token_num, C)
    assert jnp.allclose(out16, ref, atol=2e-1, rtol=2e-1), "bf16 path mismatch"

    print("KERNEL_OK")
</pallas_src>

<mosaic_0001>
module attributes {stable_mosaic.version = 11 : i64} {
  func.func @decoder_stack_kernel(%arg0: i32, %arg1: i32, %arg2: memref<8x32xf32, #tpu.memory_space<vmem>>, %arg3: memref<8x32xf32, #tpu.memory_space<vmem>>, %arg4: memref<1x6x32xf32, #tpu.memory_space<vmem>>, %arg5: memref<1x32x96xf32, #tpu.memory_space<vmem>>, %arg6: memref<1x32x32xf32, #tpu.memory_space<vmem>>, %arg7: memref<1x32x128xf32, #tpu.memory_space<vmem>>, %arg8: memref<1x1x128xf32, #tpu.memory_space<vmem>>, %arg9: memref<1x128x32xf32, #tpu.memory_space<vmem>>, %arg10: memref<2x32xf32, #tpu.memory_space<vmem>>, %arg11: memref<1x4x32xf32, #tpu.memory_space<vmem>>, %arg12: memref<8x32xf32, #tpu.memory_space<vmem>>) attributes {dimension_semantics = [#tpu.dimension_semantics<parallel>, #tpu.dimension_semantics<arbitrary>], iteration_bounds = array<i64: 2, 4>, scalar_prefetch = 0 : i64, scratch_operands = 1 : i64, tpu.core_type = #tpu.core_type<tc>, window_params = [{transform_indices = @transform_0, window_bounds = array<i64: 8, 32>}, {transform_indices = @transform_1, window_bounds = array<i64: 8, 32>}, {transform_indices = @transform_2, window_bounds = array<i64: 1, 6, 32>}, {transform_indices = @transform_3, window_bounds = array<i64: 1, 32, 96>}, {transform_indices = @transform_4, window_bounds = array<i64: 1, 32, 32>}, {transform_indices = @transform_5, window_bounds = array<i64: 1, 32, 128>}, {transform_indices = @transform_6, window_bounds = array<i64: 1, 1, 128>}, {transform_indices = @transform_7, window_bounds = array<i64: 1, 128, 32>}, {pipeline_mode = #tpu.pipeline_mode<synchronous>, transform_indices = @transform_8, window_bounds = array<i64: 2, 32>}, {transform_indices = @transform_9, window_bounds = array<i64: 1, 4, 32>}]} {
    %c0_i32 = arith.constant 0 : i32
    %0 = arith.cmpi eq, %arg1, %c0_i32 : i32
    %1 = arith.extui %0 : i1 to i32
    %c0_i32_0 = arith.constant 0 : i32
    %2 = arith.cmpi ne, %1, %c0_i32_0 : i32
    scf.if %2 {
      %c0_58 = arith.constant 0 : index
      %c0_59 = arith.constant 0 : index
      %172 = vector.load %arg2[%c0_58, %c0_59] : memref<8x32xf32, #tpu.memory_space<vmem>>, vector<8x32xf32>
      %c0_60 = arith.constant 0 : index
      %c0_61 = arith.constant 0 : index
      %173 = vector.load %arg12[%c0_60, %c0_61] : memref<8x32xf32, #tpu.memory_space<vmem>>, vector<8x32xf32>
      tpu.vector_store %arg12[%c0_60, %c0_61], %172 {strides = array<i32>} : memref<8x32xf32, #tpu.memory_space<vmem>>, vector<8x32xf32>,
    } else {
    }
    %c0 = arith.constant 0 : index
    %c0_1 = arith.constant 0 : index
    %c0_2 = arith.constant 0 : index
    %3 = vector.load %arg4[%c0, %c0_1, %c0_2] : memref<1x6x32xf32, #tpu.memory_space<vmem>>, vector<1x6x32xf32>
    %4 = vector.shape_cast %3 : vector<1x6x32xf32> to vector<6x32xf32>
    %5 = vector.extract_strided_slice %4 {offsets = [0, 0], sizes = [1, 32], strides = [1, 1]} : vector<6x32xf32> to vector<1x32xf32>
    %6 = vector.extract_strided_slice %4 {offsets = [1, 0], sizes = [1, 32], strides = [1, 1]} : vector<6x32xf32> to vector<1x32xf32>
    %7 = vector.extract_strided_slice %4 {offsets = [2, 0], sizes = [1, 32], strides = [1, 1]} : vector<6x32xf32> to vector<1x32xf32>
    %8 = vector.extract_strided_slice %4 {offsets = [3, 0], sizes = [1, 32], strides = [1, 1]} : vector<6x32xf32> to vector<1x32xf32>
    %9 = vector.extract_strided_slice %4 {offsets = [4, 0], sizes = [1, 32], strides = [1, 1]} : vector<6x32xf32> to vector<1x32xf32>
    %10 = vector.extract_strided_slice %4 {offsets = [5, 0], sizes = [1, 32], strides = [1, 1]} : vector<6x32xf32> to vector<1x32xf32>
    %c0_3 = arith.constant 0 : index
    %c0_4 = arith.constant 0 : index
    %c0_5 = arith.constant 0 : index
    %11 = vector.load %arg8[%c0_3, %c0_4, %c0_5] : memref<1x1x128xf32, #tpu.memory_space<vmem>>, vector<1x1x128xf32>
    %12 = vector.shape_cast %11 : vector<1x1x128xf32> to vector<1x128xf32>
    %c0_6 = arith.constant 0 : index
    %c0_7 = arith.constant 0 : index
    %13 = vector.load %arg12[%c0_6, %c0_7] : memref<8x32xf32, #tpu.memory_space<vmem>>, vector<8x32xf32>
    %c0_8 = arith.constant 0 : index
    %c0_9 = arith.constant 0 : index
    %14 = vector.load %arg3[%c0_8, %c0_9] : memref<8x32xf32, #tpu.memory_space<vmem>>, vector<8x32xf32>
    %15 = arith.addf %13, %14 : vector<8x32xf32>
    %cst = arith.constant dense<0.000000e+00> : vector<8xf32>
    %16 = vector.multi_reduction <add>, %15, %cst [1] : vector<8x32xf32> to vector<8xf32>
    %17 = vector.shape_cast %16 : vector<8xf32> to vector<8x1xf32>
    %cst_10 = arith.constant 3.200000e+01 : f32
    %18 = vector.broadcast %cst_10 : f32 to vector<8x1xf32>
    %19 = arith.divf %17, %18 : vector<8x1xf32>
    %20 = vector.broadcast %19 : vector<8x1xf32> to vector<8x32xf32>
    %21 = arith.subf %15, %20 : vector<8x32xf32>
    %22 = arith.mulf %21, %21 : vector<8x32xf32>
    %cst_11 = arith.constant dense<0.000000e+00> : vector<8xf32>
    %23 = vector.multi_reduction <add>, %22, %cst_11 [1] : vector<8x32xf32> to vector<8xf32>
    %24 = vector.shape_cast %23 : vector<8xf32> to vector<8x1xf32>
    %cst_12 = arith.constant 3.200000e+01 : f32
    %25 = vector.broadcast %cst_12 : f32 to vector<8x1xf32>
    %26 = arith.divf %24, %25 : vector<8x1xf32>
    %27 = vector.broadcast %19 : vector<8x1xf32> to vector<8x32xf32>
    %28 = arith.subf %15, %27 : vector<8x32xf32>
    %cst_13 = arith.constant 9.99999974E-6 : f32
    %29 = vector.broadcast %cst_13 : f32 to vector<8x1xf32>
    %30 = arith.addf %26, %29 : vector<8x1xf32>
    %31 = math.rsqrt %30 : vector<8x1xf32>
    %32 = vector.broadcast %31 : vector<8x1xf32> to vector<8x32xf32>
    %33 = arith.mulf %28, %32 : vector<8x32xf32>
    %34 = vector.broadcast %5 : vector<1x32xf32> to vector<8x32xf32>
    %35 = arith.mulf %33, %34 : vector<8x32xf32>
    %36 = vector.broadcast %6 : vector<1x32xf32> to vector<8x32xf32>
    %37 = arith.addf %35, %36 : vector<8x32xf32>
    %c0_14 = arith.constant 0 : index
    %c0_15 = arith.constant 0 : index
    %c0_16 = arith.constant 0 : index
    %38 = vector.load %arg5[%c0_14, %c0_15, %c0_16] : memref<1x32x96xf32, #tpu.memory_space<vmem>>, vector<1x32x96xf32>
    %39 = vector.shape_cast %38 : vector<1x32x96xf32> to vector<32x96xf32>
    %cst_17 = arith.constant dense<0.000000e+00> : vector<8x96xf32>
    %40 = tpu.matmul %37, %39, %cst_17 {dimension_numbers = #tpu.dot_dimension_numbers<[1], [0], [0], [1], [0, 0, 1, 1], [], []>} : vector<8x32xf32>, vector<32x96xf32>, vector<8x96xf32> -> vector<8x96xf32>
    %41 = vector.extract_strided_slice %40 {offsets = [0, 0], sizes = [8, 8], strides = [1, 1]} : vector<8x96xf32> to vector<8x8xf32>
    %42 = vector.shape_cast %41 : vector<8x8xf32> to vector<1x8x8xf32>
    %43 = vector.extract_strided_slice %40 {offsets = [0, 32], sizes = [8, 8], strides = [1, 1]} : vector<8x96xf32> to vector<8x8xf32>
    %44 = vector.shape_cast %43 : vector<8x8xf32> to vector<1x8x8xf32>
    %45 = vector.extract_strided_slice %40 {offsets = [0, 64], sizes = [8, 8], strides = [1, 1]} : vector<8x96xf32> to vector<8x8xf32>
    %46 = vector.shape_cast %45 : vector<8x8xf32> to vector<1x8x8xf32>
    %47 = vector.extract_strided_slice %40 {offsets = [0, 8], sizes = [8, 8], strides = [1, 1]} : vector<8x96xf32> to vector<8x8xf32>
    %48 = vector.shape_cast %47 : vector<8x8xf32> to vector<1x8x8xf32>
    %49 = vector.extract_strided_slice %40 {offsets = [0, 40], sizes = [8, 8], strides = [1, 1]} : vector<8x96xf32> to vector<8x8xf32>
    %50 = vector.shape_cast %49 : vector<8x8xf32> to vector<1x8x8xf32>
    %51 = vector.extract_strided_slice %40 {offsets = [0, 72], sizes = [8, 8], strides = [1, 1]} : vector<8x96xf32> to vector<8x8xf32>
    %52 = vector.shape_cast %51 : vector<8x8xf32> to vector<1x8x8xf32>
    %53 = vector.extract_strided_slice %40 {offsets = [0, 16], sizes = [8, 8], strides = [1, 1]} : vector<8x96xf32> to vector<8x8xf32>
    %54 = vector.shape_cast %53 : vector<8x8xf32> to vector<1x8x8xf32>
    %55 = vector.extract_strided_slice %40 {offsets = [0, 48], sizes = [8, 8], strides = [1, 1]} : vector<8x96xf32> to vector<8x8xf32>
    %56 = vector.shape_cast %55 : vector<8x8xf32> to vector<1x8x8xf32>
    %57 = vector.extract_strided_slice %40 {offsets = [0, 80], sizes = [8, 8], strides = [1, 1]} : vector<8x96xf32> to vector<8x8xf32>
    %58 = vector.shape_cast %57 : vector<8x8xf32> to vector<1x8x8xf32>
    %59 = vector.extract_strided_slice %40 {offsets = [0, 24], sizes = [8, 8], strides = [1, 1]} : vector<8x96xf32> to vector<8x8xf32>
    %60 = vector.shape_cast %59 : vector<8x8xf32> to vector<1x8x8xf32>
    %61 = vector.extract_strided_slice %40 {offsets = [0, 56], sizes = [8, 8], strides = [1, 1]} : vector<8x96xf32> to vector<8x8xf32>
    %62 = vector.shape_cast %61 : vector<8x8xf32> to vector<1x8x8xf32>
    %63 = vector.extract_strided_slice %40 {offsets = [0, 88], sizes = [8, 8], strides = [1, 1]} : vector<8x96xf32> to vector<8x8xf32>
    %64 = vector.shape_cast %63 : vector<8x8xf32> to vector<1x8x8xf32>
    %65 = tpu.concatenate %42, %48, %54, %60 in 0 : vector<1x8x8xf32>, vector<1x8x8xf32>, vector<1x8x8xf32>, vector<1x8x8xf32> -> vector<4x8x8xf32>
    %66 = tpu.concatenate %44, %50, %56, %62 in 0 : vector<1x8x8xf32>, vector<1x8x8xf32>, vector<1x8x8xf32>, vector<1x8x8xf32> -> vector<4x8x8xf32>
    %67 = tpu.concatenate %46, %52, %58, %64 in 0 : vector<1x8x8xf32>, vector<1x8x8xf32>, vector<1x8x8xf32>, vector<1x8x8xf32> -> vector<4x8x8xf32>
    "tpu.trace_start"() <{level = 10 : i32, message = "gnd,gmd->gnm"}> : () -> ()
    %cst_18 = arith.constant dense<0.000000e+00> : vector<4x8x8xf32>
    %68 = tpu.matmul %65, %66, %cst_18 {dimension_numbers = #tpu.dot_dimension_numbers<[2], [2], [1], [1], [0, 0, 0, 1, 1, 1], [0], [0]>} : vector<4x8x8xf32>, vector<4x8x8xf32>, vector<4x8x8xf32> -> vector<4x8x8xf32>
    "tpu.trace_stop"() : () -> ()
    %cst_19 = arith.constant dense<0xFF800000> : vector<4x8xf32>
    %69 = vector.multi_reduction <maximumf>, %68, %cst_19 [2] : vector<4x8x8xf32> to vector<4x8xf32>
    %70 = vector.shape_cast %69 : vector<4x8xf32> to vector<4x8x1xf32>
    %71 = vector.broadcast %70 : vector<4x8x1xf32> to vector<4x8x8xf32>
    %72 = arith.subf %68, %71 : vector<4x8x8xf32>
    %73 = math.exp %72 : vector<4x8x8xf32>
    %cst_20 = arith.constant dense<0.000000e+00> : vector<4x8xf32>
    %74 = vector.multi_reduction <add>, %73, %cst_20 [2] : vector<4x8x8xf32> to vector<4x8xf32>
    %75 = vector.shape_cast %74 : vector<4x8xf32> to vector<4x8x1xf32>
    %76 = vector.broadcast %75 : vector<4x8x1xf32> to vector<4x8x8xf32>
    %77 = arith.divf %73, %76 : vector<4x8x8xf32>
    "tpu.trace_start"() <{level = 10 : i32, message = "gnm,gmd->gnd"}> : () -> ()
    %cst_21 = arith.constant dense<0.000000e+00> : vector<4x8x8xf32>
    %78 = tpu.matmul %77, %67, %cst_21 {dimension_numbers = #tpu.dot_dimension_numbers<[2], [1], [1], [2], [0, 0, 0, 1, 1, 2], [0], [0]>} : vector<4x8x8xf32>, vector<4x8x8xf32>, vector<4x8x8xf32> -> vector<4x8x8xf32>
    "tpu.trace_stop"() : () -> ()
    %79 = vector.extract_strided_slice %78 {offsets = [0, 0, 0], sizes = [1, 8, 8], strides = [1, 1, 1]} : vector<4x8x8xf32> to vector<1x8x8xf32>
    %80 = vector.shape_cast %79 : vector<1x8x8xf32> to vector<8x8xf32>
    %81 = vector.extract_strided_slice %78 {offsets = [1, 0, 0], sizes = [1, 8, 8], strides = [1, 1, 1]} : vector<4x8x8xf32> to vector<1x8x8xf32>
    %82 = vector.shape_cast %81 : vector<1x8x8xf32> to vector<8x8xf32>
    %83 = vector.extract_strided_slice %78 {offsets = [2, 0, 0], sizes = [1, 8, 8], strides = [1, 1, 1]} : vector<4x8x8xf32> to vector<1x8x8xf32>
    %84 = vector.shape_cast %83 : vector<1x8x8xf32> to vector<8x8xf32>
    %85 = vector.extract_strided_slice %78 {offsets = [3, 0, 0], sizes = [1, 8, 8], strides = [1, 1, 1]} : vector<4x8x8xf32> to vector<1x8x8xf32>
    %86 = vector.shape_cast %85 : vector<1x8x8xf32> to vector<8x8xf32>
    %87 = tpu.concatenate %80, %82, %84, %86 in 1 : vector<8x8xf32>, vector<8x8xf32>, vector<8x8xf32>, vector<8x8xf32> -> vector<8x32xf32>
    %c0_22 = arith.constant 0 : index
    %c0_23 = arith.constant 0 : index
    %c0_24 = arith.constant 0 : index
    %88 = vector.load %arg6[%c0_22, %c0_23, %c0_24] : memref<1x32x32xf32, #tpu.memory_space<vmem>>, vector<1x32x32xf32>
    %89 = vector.shape_cast %88 : vector<1x32x32xf32> to vector<32x32xf32>
    %cst_25 = arith.constant dense<0.000000e+00> : vector<8x32xf32>
    %90 = tpu.matmul %87, %89, %cst_25 {dimension_numbers = #tpu.dot_dimension_numbers<[1], [0], [0], [1], [0, 0, 1, 1], [], []>} : vector<8x32xf32>, vector<32x32xf32>, vector<8x32xf32> -> vector<8x32xf32>
    %91 = vector.broadcast %7 : vector<1x32xf32> to vector<8x32xf32>
    %92 = arith.addf %90, %91 : vector<8x32xf32>
    %93 = arith.addf %15, %92 : vector<8x32xf32>
    %cst_26 = arith.constant dense<0.000000e+00> : vector<8xf32>
    %94 = vector.multi_reduction <add>, %93, %cst_26 [1] : vector<8x32xf32> to vector<8xf32>
    %95 = vector.shape_cast %94 : vector<8xf32> to vector<8x1xf32>
    %cst_27 = arith.constant 3.200000e+01 : f32
    %96 = vector.broadcast %cst_27 : f32 to vector<8x1xf32>
    %97 = arith.divf %95, %96 : vector<8x1xf32>
    %98 = vector.broadcast %97 : vector<8x1xf32> to vector<8x32xf32>
    %99 = arith.subf %93, %98 : vector<8x32xf32>
    %100 = arith.mulf %99, %99 : vector<8x32xf32>
    %cst_28 = arith.constant dense<0.000000e+00> : vector<8xf32>
    %101 = vector.multi_reduction <add>, %100, %cst_28 [1] : vector<8x32xf32> to vector<8xf32>
    %102 = vector.shape_cast %101 : vector<8xf32> to vector<8x1xf32>
    %cst_29 = arith.constant 3.200000e+01 : f32
    %103 = vector.broadcast %cst_29 : f32 to vector<8x1xf32>
    %104 = arith.divf %102, %103 : vector<8x1xf32>
    %105 = vector.broadcast %97 : vector<8x1xf32> to vector<8x32xf32>
    %106 = arith.subf %93, %105 : vector<8x32xf32>
    %cst_30 = arith.constant 9.99999974E-6 : f32
    %107 = vector.broadcast %cst_30 : f32 to vector<8x1xf32>
    %108 = arith.addf %104, %107 : vector<8x1xf32>
    %109 = math.rsqrt %108 : vector<8x1xf32>
    %110 = vector.broadcast %109 : vector<8x1xf32> to vector<8x32xf32>
    %111 = arith.mulf %106, %110 : vector<8x32xf32>
    %112 = vector.broadcast %8 : vector<1x32xf32> to vector<8x32xf32>
    %113 = arith.mulf %111, %112 : vector<8x32xf32>
    %114 = vector.broadcast %9 : vector<1x32xf32> to vector<8x32xf32>
    %115 = arith.addf %113, %114 : vector<8x32xf32>
    %c0_31 = arith.constant 0 : index
    %c0_32 = arith.constant 0 : index
    %c0_33 = arith.constant 0 : index
    %116 = vector.load %arg7[%c0_31, %c0_32, %c0_33] : memref<1x32x128xf32, #tpu.memory_space<vmem>>, vector<1x32x128xf32>
    %117 = vector.shape_cast %116 : vector<1x32x128xf32> to vector<32x128xf32>
    %cst_34 = arith.constant dense<0.000000e+00> : vector<8x128xf32>
    %118 = tpu.matmul %115, %117, %cst_34 {dimension_numbers = #tpu.dot_dimension_numbers<[1], [0], [0], [1], [0, 0, 1, 1], [], []>} : vector<8x32xf32>, vector<32x128xf32>, vector<8x128xf32> -> vector<8x128xf32>
    %119 = vector.broadcast %12 : vector<1x128xf32> to vector<8x128xf32>
    %120 = arith.addf %118, %119 : vector<8x128xf32>
    %cst_35 = arith.constant 5.000000e-01 : f32
    %121 = vector.broadcast %cst_35 : f32 to vector<8x128xf32>
    %122 = arith.mulf %121, %120 : vector<8x128xf32>
    %cst_36 = arith.constant 0.707106769 : f32
    %123 = vector.broadcast %cst_36 : f32 to vector<8x128xf32>
    %124 = arith.mulf %120, %123 : vector<8x128xf32>
    %cst_37 = arith.constant 0.000000e+00 : f32
    %125 = vector.broadcast %cst_37 : f32 to vector<8x128xf32>
    %126 = arith.cmpf oge, %124, %125 : vector<8x128xf32>
    %cst_38 = arith.constant 1.000000e+00 : f32
    %cst_39 = arith.constant -1.000000e+00 : f32
    %127 = vector.broadcast %cst_38 : f32 to vector<8x128xf32>
    %128 = vector.broadcast %cst_39 : f32 to vector<8x128xf32>
    %129 = arith.select %126, %127, %128 : vector<8x128xi1>, vector<8x128xf32>
    %130 = math.absf %124 : vector<8x128xf32>
    %cst_40 = arith.constant 0.327591091 : f32
    %131 = vector.broadcast %cst_40 : f32 to vector<8x128xf32>
    %132 = arith.mulf %131, %130 : vector<8x128xf32>
    %cst_41 = arith.constant 1.000000e+00 : f32
    %133 = vector.broadcast %cst_41 : f32 to vector<8x128xf32>
    %134 = arith.addf %133, %132 : vector<8x128xf32>
    %cst_42 = arith.constant 1.000000e+00 : f32
    %135 = vector.broadcast %cst_42 : f32 to vector<8x128xf32>
    %136 = arith.divf %135, %134 : vector<8x128xf32>
    %cst_43 = arith.constant 1.06140542 : f32
    %137 = vector.broadcast %cst_43 : f32 to vector<8x128xf32>
    %138 = arith.mulf %137, %136 : vector<8x128xf32>
    %cst_44 = arith.constant -1.45315206 : f32
    %139 = vector.broadcast %cst_44 : f32 to vector<8x128xf32>
    %140 = arith.addf %138, %139 : vector<8x128xf32>
    %141 = arith.mulf %140, %136 : vector<8x128xf32>
    %cst_45 = arith.constant 1.42141378 : f32
    %142 = vector.broadcast %cst_45 : f32 to vector<8x128xf32>
    %143 = arith.addf %141, %142 : vector<8x128xf32>
    %144 = arith.mulf %143, %136 : vector<8x128xf32>
    %cst_46 = arith.constant -0.284496725 : f32
    %145 = vector.broadcast %cst_46 : f32 to vector<8x128xf32>
    %146 = arith.addf %144, %145 : vector<8x128xf32>
    %147 = arith.mulf %146, %136 : vector<8x128xf32>
    %cst_47 = arith.constant 0.254829586 : f32
    %148 = vector.broadcast %cst_47 : f32 to vector<8x128xf32>
    %149 = arith.addf %147, %148 : vector<8x128xf32>
    %150 = arith.mulf %149, %136 : vector<8x128xf32>
    %cst_48 = arith.constant 0.000000e+00 : f32
    %151 = vector.broadcast %cst_48 : f32 to vector<8x128xf32>
    %152 = arith.subf %151, %130 : vector<8x128xf32>
    %153 = arith.mulf %152, %130 : vector<8x128xf32>
    %154 = math.exp %153 : vector<8x128xf32>
    %155 = arith.mulf %150, %154 : vector<8x128xf32>
    %cst_49 = arith.constant 1.000000e+00 : f32
    %156 = vector.broadcast %cst_49 : f32 to vector<8x128xf32>
    %157 = arith.subf %156, %155 : vector<8x128xf32>
    %158 = arith.mulf %129, %157 : vector<8x128xf32>
    %cst_50 = arith.constant 1.000000e+00 : f32
    %159 = vector.broadcast %cst_50 : f32 to vector<8x128xf32>
    %160 = arith.addf %159, %158 : vector<8x128xf32>
    %161 = arith.mulf %122, %160 : vector<8x128xf32>
    %c0_51 = arith.constant 0 : index
    %c0_52 = arith.constant 0 : index
    %c0_53 = arith.constant 0 : index
    %162 = vector.load %arg9[%c0_51, %c0_52, %c0_53] : memref<1x128x32xf32, #tpu.memory_space<vmem>>, vector<1x128x32xf32>
    %163 = vector.shape_cast %162 : vector<1x128x32xf32> to vector<128x32xf32>
    %cst_54 = arith.constant dense<0.000000e+00> : vector<8x32xf32>
    %164 = tpu.matmul %161, %163, %cst_54 {dimension_numbers = #tpu.dot_dimension_numbers<[1], [0], [0], [1], [0, 0, 1, 1], [], []>} : vector<8x128xf32>, vector<128x32xf32>, vector<8x32xf32> -> vector<8x32xf32>
    %165 = vector.broadcast %10 : vector<1x32xf32> to vector<8x32xf32>
    %166 = arith.addf %164, %165 : vector<8x32xf32>
    %167 = arith.addf %93, %166 : vector<8x32xf32>
    %c0_55 = arith.constant 0 : index
    %c0_56 = arith.constant 0 : index
    %168 = vector.load %arg12[%c0_55, %c0_56] : memref<8x32xf32, #tpu.memory_space<vmem>>, vector<8x32xf32>
    tpu.vector_store %arg12[%c0_55, %c0_56], %167 {strides = array<i32>} : memref<8x32xf32, #tpu.memory_space<vmem>>, vector<8x32xf32>,
    %c3_i32 = arith.constant 3 : i32
    %169 = arith.cmpi eq, %arg1, %c3_i32 : i32
    %170 = arith.extui %169 : i1 to i32
    %c0_i32_57 = arith.constant 0 : i32
    %171 = arith.cmpi ne, %170, %c0_i32_57 : i32
    scf.if %171 {
      %c0_58 = arith.constant 0 : index
      %c0_59 = arith.constant 0 : index
      %172 = vector.load %arg10[%c0_58, %c0_59] : memref<2x32xf32, #tpu.memory_space<vmem>>, vector<1x32xf32>
      %c1 = arith.constant 1 : index
      %c0_60 = arith.constant 0 : index
      %173 = vector.load %arg10[%c1, %c0_60] : memref<2x32xf32, #tpu.memory_space<vmem>>, vector<1x32xf32>
      %174 = vector.shape_cast %167 : vector<8x32xf32> to vector<1x8x32xf32>
      %175 = vector.extract_strided_slice %174 {offsets = [0, 4, 0], sizes = [1, 4, 32], strides = [1, 1, 1]} : vector<1x8x32xf32> to vector<1x4x32xf32>
      %cst_61 = arith.constant dense<0.000000e+00> : vector<1x4xf32>
      %176 = vector.multi_reduction <add>, %175, %cst_61 [2] : vector<1x4x32xf32> to vector<1x4xf32>
      %177 = vector.shape_cast %176 : vector<1x4xf32> to vector<1x4x1xf32>
      %cst_62 = arith.constant 3.200000e+01 : f32
      %178 = vector.broadcast %cst_62 : f32 to vector<1x4x1xf32>
      %179 = arith.divf %177, %178 : vector<1x4x1xf32>
      %180 = vector.broadcast %179 : vector<1x4x1xf32> to vector<1x4x32xf32>
      %181 = arith.subf %175, %180 : vector<1x4x32xf32>
      %182 = arith.mulf %181, %181 : vector<1x4x32xf32>
      %cst_63 = arith.constant dense<0.000000e+00> : vector<1x4xf32>
      %183 = vector.multi_reduction <add>, %182, %cst_63 [2] : vector<1x4x32xf32> to vector<1x4xf32>
      %184 = vector.shape_cast %183 : vector<1x4xf32> to vector<1x4x1xf32>
      %cst_64 = arith.constant 3.200000e+01 : f32
      %185 = vector.broadcast %cst_64 : f32 to vector<1x4x1xf32>
      %186 = arith.divf %184, %185 : vector<1x4x1xf32>
      %187 = vector.broadcast %179 : vector<1x4x1xf32> to vector<1x4x32xf32>
      %188 = arith.subf %175, %187 : vector<1x4x32xf32>
      %cst_65 = arith.constant 9.99999974E-6 : f32
      %189 = vector.broadcast %cst_65 : f32 to vector<1x4x1xf32>
      %190 = arith.addf %186, %189 : vector<1x4x1xf32>
      %191 = math.rsqrt %190 : vector<1x4x1xf32>
      %192 = vector.broadcast %191 : vector<1x4x1xf32> to vector<1x4x32xf32>
      %193 = arith.mulf %188, %192 : vector<1x4x32xf32>
      %194 = vector.shape_cast %172 : vector<1x32xf32> to vector<1x1x32xf32>
      %195 = vector.broadcast %194 : vector<1x1x32xf32> to vector<1x4x32xf32>
      %196 = arith.mulf %193, %195 : vector<1x4x32xf32>
      %197 = vector.shape_cast %173 : vector<1x32xf32> to vector<1x1x32xf32>
      %198 = vector.broadcast %197 : vector<1x1x32xf32> to vector<1x4x32xf32>
      %199 = arith.addf %196, %198 : vector<1x4x32xf32>
      %c0_66 = arith.constant 0 : index
      %c0_67 = arith.constant 0 : index
      %c0_68 = arith.constant 0 : index
      %200 = vector.load %arg11[%c0_66, %c0_67, %c0_68] : memref<1x4x32xf32, #tpu.memory_space<vmem>>, vector<1x4x32xf32>
      tpu.vector_store %arg11[%c0_66, %c0_67, %c0_68], %199 {strides = array<i32>} : memref<1x4x32xf32, #tpu.memory_space<vmem>>, vector<1x4x32xf32>,
    } else {
    }
    return
  }
  func.func @transform_0(%arg0: i32, %arg1: i32) -> (i32, i32) {
    %c0_i32 = arith.constant 0 : i32
    %c0_i32_0 = arith.constant 0 : i32
    return %arg0, %c0_i32 : i32, i32
  }
  func.func @transform_1(%arg0: i32, %arg1: i32) -> (i32, i32) {
    %c0_i32 = arith.constant 0 : i32
    %c0_i32_0 = arith.constant 0 : i32
    return %arg0, %c0_i32 : i32, i32
  }
  func.func @transform_2(%arg0: i32, %arg1: i32) -> (i32, i32, i32) {
    %c0_i32 = arith.constant 0 : i32
    %c0_i32_0 = arith.constant 0 : i32
    %c0_i32_1 = arith.constant 0 : i32
    return %arg1, %c0_i32, %c0_i32_0 : i32, i32, i32
  }
  func.func @transform_3(%arg0: i32, %arg1: i32) -> (i32, i32, i32) {
    %c0_i32 = arith.constant 0 : i32
    %c0_i32_0 = arith.constant 0 : i32
    %c0_i32_1 = arith.constant 0 : i32
    return %arg1, %c0_i32, %c0_i32_0 : i32, i32, i32
  }
  func.func @transform_4(%arg0: i32, %arg1: i32) -> (i32, i32, i32) {
    %c0_i32 = arith.constant 0 : i32
    %c0_i32_0 = arith.constant 0 : i32
    %c0_i32_1 = arith.constant 0 : i32
    return %arg1, %c0_i32, %c0_i32_0 : i32, i32, i32
  }
  func.func @transform_5(%arg0: i32, %arg1: i32) -> (i32, i32, i32) {
    %c0_i32 = arith.constant 0 : i32
    %c0_i32_0 = arith.constant 0 : i32
    %c0_i32_1 = arith.constant 0 : i32
    return %arg1, %c0_i32, %c0_i32_0 : i32, i32, i32
  }
  func.func @transform_6(%arg0: i32, %arg1: i32) -> (i32, i32, i32) {
    %c0_i32 = arith.constant 0 : i32
    %c0_i32_0 = arith.constant 0 : i32
    %c0_i32_1 = arith.constant 0 : i32
    return %arg1, %c0_i32, %c0_i32_0 : i32, i32, i32
  }
  func.func @transform_7(%arg0: i32, %arg1: i32) -> (i32, i32, i32) {
    %c0_i32 = arith.constant 0 : i32
    %c0_i32_0 = arith.constant 0 : i32
    %c0_i32_1 = arith.constant 0 : i32
    return %arg1, %c0_i32, %c0_i32_0 : i32, i32, i32
  }
  func.func @transform_8(%arg0: i32, %arg1: i32) -> (i32, i32) {
    %c0_i32 = arith.constant 0 : i32
    %c0_i32_0 = arith.constant 0 : i32
    %c0_i32_1 = arith.constant 0 : i32
    return %c0_i32, %c0_i32_0 : i32, i32
  }
  func.func @transform_9(%arg0: i32, %arg1: i32) -> (i32, i32, i32) {
    %c0_i32 = arith.constant 0 : i32
    %c0_i32_0 = arith.constant 0 : i32
    %c0_i32_1 = arith.constant 0 : i32
    return %arg0, %c0_i32, %c0_i32_0 : i32, i32, i32
  }
}

</mosaic_0001>

<bundles_post_ra>
// kernel: tpu_custom_call.1
= control target key start
LH: loop header
LB: loop body
LE: loop exit
PB: predicated region body
PF: predicated region fallthrough
CT: control target
= control target key end

     0   :  { %s2575_s0 = inlined_call_operand.vmem [shape: f32[16,32], index: 0, kind: input, shape index: {}]   ;;  %s2576_s1 = inlined_call_operand.vmem [shape: f32[16,32], index: 1, kind: input, shape index: {}]   ;;  %s2577_s2 = inlined_call_operand.vmem [shape: f32[4,6,32], index: 2, kind: input, shape index: {}]   ;;  %s2578_s3 = inlined_call_operand.vmem [shape: f32[4,32,96], index: 3, kind: input, shape index: {}]   ;;  %s2579_s4 = inlined_call_operand.vmem [shape: f32[4,32,32], index: 4, kind: input, shape index: {}]   ;;  %s2580_s5 = inlined_call_operand.vmem [shape: f32[4,32,128], index: 5, kind: input, shape index: {}]   ;;  %s2581_s6 = inlined_call_operand.vmem [shape: f32[4,1,128], index: 6, kind: input, shape index: {}]   ;;  %s2582_s7 = inlined_call_operand.vmem [shape: f32[4,128,32], index: 7, kind: input, shape index: {}]   ;;  %s2583_s8 = inlined_call_operand.vmem [shape: f32[2,32], index: 8, kind: input, shape index: {}]   ;;  %s2584_s9 = inlined_call_operand.hbm [shape: f32[2,4,32], index: 9, kind: output, shape index: {}]  }
   0x1   :  { %2597 = sst [smem:[#allocation16_spill]] %s2575_s0 }
   0x2   :  { %2598 = sst [smem:[#allocation17_spill]] %s2576_s1 }
   0x3   :  { %2599 = sst [smem:[#allocation18_spill]] %s2584_s9 }
   0x4   :  { %14 = vsyncpa [#allocation4], 0 }
   0x5   :  { %16 = vsyncpa [#allocation4 + $0x1], 0  ;;  %s2227_s30 = smov 0   ;;  %s2229_s10 = smov 0  }
   0x6   :  { %s2231_s11 = smov 0   ;;  %s2233_s12 = smov 0  }
   0x7   :  { %s2235_s13 = smov 0   ;;  %s2237_s14 = smov 0  }
   0x8   :  { %s2239_s15 = smov 0   ;;  %s2241_s16 = smov 0  }
   0x9 LB: > { %2600 = sst [smem:[#allocation6_spill]] %s2135_s30  ;;  %s1762_s17 = sadd.s32 4294967295, %s2163_s16   ;;  %s2163_s16 = sphi %s2241_s16, %s22_s16   ;;  %s2159_s15 = sphi %s2239_s15, %s2625_s15   ;;  %s2155_s14 = sphi %s2237_s14, %s2624_s14   ;;  %s2151_s13 = sphi %s2235_s13, %s2623_s13   ;;  %s2147_s12 = sphi %s2233_s12, %s2622_s12   ;;  %s2143_s11 = sphi %s2231_s11, %s2628_s11   ;;  %s2139_s10 = sphi %s2229_s10, %s2627_s10   ;;  %s2135_s30 = sphi %s2227_s30, %s2626_s30  }
   0xa   : > { %2601 = sst [smem:[#allocation7_spill]] %s2143_s11  ;;  %s1763_s18 = sadd.s32 4294967294, %s2163_s16  }
   0xb   : > { %2602 = sst [smem:[#allocation8_spill]] %s2155_s14  ;;  %s31_s19 = sadd.s32 1, %s2155_s14 }
   0xc   : > { %2603 = sst [smem:[#allocation9_spill]] %s2159_s15  ;;  %p32_p0 = scmp.ge.s32.totalorder %s31_s19, 4 }
   0xd   : > { %2604 = sst [smem:[#allocation10_spill]] %s2163_s16  ;;  %s34_s20 = sadd.s32 1, %s2159_s15 }
   0xe   : > { %p280_p1 = scmp.ne.s32.totalorder %s2143_s11, %s2139_s10  ;;  %p281_p2 = scmp.eq.s32.totalorder %s1762_s17, 7 }
   0xf   : > { %s2630_s19 = smov (%p32_p0, %s31_s19), 0  ;;  %s2632_s20 = smov (!%p32_p0, %s34_s20), %s2159_s15 }
  0x10   : > { %2605 = sst [smem:[#allocation11_spill]] %s2630_s19  ;;  %p2276_p3 = por %p281_p2, %p280_p1 }
  0x11   : > { %p286_p4 = scmp.ne.s32.totalorder %s2139_s10, %s2135_s30  ;;  %p36_p5 = scmp.ge.s32.totalorder %s2632_s20, 2 }
  0x12   : > { %s2606_s21 = scalar_select %p2276_p3, 1, 0 }
  0x13   : > { %p287_p6 = scmp.eq.s32.totalorder %s1763_s18, 7  ;;  %p1766_p7 = scmp.ge.s32.totalorder %s2163_s16, 1 }
  0x14   : > { %2607 = sst [smem:[#allocation12_spill]] %s2606_s21  ;;  %p367_p8 = scmp.lt.s32.totalorder %s2163_s16, 9 }
  0x15   : > { %s2634_s20 = smov (%p36_p5, %s2632_s20), 0  ;;  %p2286_p9 = por %p287_p6, %p286_p4 }
  0x16   : > { %2608 = sst [smem:[#allocation13_spill]] %s2634_s20  ;;  %p368_p10 = pnand %p1766_p7, %p367_p8 }
  0x17   : > { %s2609_s22 = scalar_select %p2286_p9, 1, 0 }
  0x18   : > { %s267_s23 = ssub.s32 %s2159_s15, %s2634_s20  ;;  %s270_s24 = sadd.s32 1, %s2143_s11 }
  0x19   : > { %2610 = sst [smem:[#allocation14_spill]] %s2609_s22  ;;  %p268_p11 = scmp.eq.s32.totalorder %s267_s23, 0 }
  0x1a   : > { %371 = sbr.rel (%p368_p10) target bundleno = 2895 (0xb4f), region = 56  ;;  %s2587_s26 = sand.u32 (!%p368_p10), 1, %s2139_s10  }
  0x1b   : > { %s2294_s25 = scalar_select %p268_p11, %s2143_s11, %s270_s24  }
  0x1c   : > { %p433_p12 = scmp.lt.s32.totalorder (!%p368_p10), %s2151_s13, 1  ;;  %s2300_s27 = sshll.u32 (!%p368_p10), %s2587_s26, 2 }
  0x1d   : > { %2611 = sst [smem:[#allocation15_spill]] %s2294_s25  ;;  %p441_p13 = scmp.lt.s32.totalorder (!%p368_p10), %s2147_s12, 3 }
  0x1e   : > { %s2612_s0 = sld [smem:[#allocation16_spill]] (!%p368_p10)  ;;  %s432_s16 = scalar_lea.vmem (!%p368_p10), [#allocation3], %s2300_s27 }
  0x1f   : > { %s434_s28 = scalar_select %p433_p12, %s2151_s13, 1 }
  0x20   : > { %s2305_s29 = scalar_select %p441_p13, %s2147_s12, 3 }
  0x21   : > { %s1768_s17 = sshll.u32 %s434_s28, 3  ;;  %s2613_s1 = sld [smem:[#allocation17_spill]] }
  0x22   : > { %s1770_s26 = sshll.u32 %s2305_s29, 3  ;;  %s1803_s14 = sshll.u32 %s2305_s29, 5 }
  0x23   : > { %s2318_s22 = scalar_lea.vmem %s2577_s2, %s1770_s26  ;;  %s2323_s9 = scalar_lea.vmem %s2578_s3, %s1803_s14 }
  0x24   : > { %s436_s24 = scalar_lea.vmem %s2612_s0, %s1768_s17  ;;  %s2328_s18 = scalar_lea.vmem %s2579_s4, %s1803_s14 }
  0x25   : > { %s2333_s20 = scalar_lea.vmem %s2580_s5, %s1803_s14  ;;  %s462_s11 = scalar_lea.vmem %s2581_s6, %s2305_s29 }
  0x26   : > { %s1806_s25 = sshll.u32 %s2305_s29, 7  ;;  %p1779_p0 = scmp.ne.s32.totalorder %s2147_s12, 0 }
  0x27   : > { %s440_s15 = scalar_lea.vmem %s2613_s1, %s1768_s17  ;;  %s2343_s30 = scalar_lea.vmem %s2582_s7, %s1806_s25 }
  0x28   : > { %471 = sbr.rel (%p1779_p0) target bundleno = 47 (0x2f), region = 60 }
  0x2d   : > { %v472_v0 = vld [vmem:[%s436_s24] sm:$0xff]  ;;  %vm473_vm0 = vcmask 261120  }
  0x2e   : > { %474 = vst.msk [vmem:[#allocation2] sm:$0xff] %vm473_vm0, %v472_v0 }
  0x2f PF: > { %v478_v2 = vld [vmem:[%s440_s15] sm:$0xff]  ;;  %vm480_vm1 = vcmask 261120   ;;  %v508_v10 = vld [vmem:[%s2323_s9 + $0x18] sm:$0xff]  ;;  %v2165_v11 = vmov 0.0   ;;  %v507_v12 = vld [vmem:[%s2323_s9 + $0x10] sm:$0xff]  ;;  %vm2166_vm2 = vmmov 0   ;;  %v495_v18 = vlaneseq }
  0x30   : > { %1855 = vmatprep.subr.mxu1 %v2165_v11  ;;  %1863 = vmatprep.mubr.msk.f32.mxu1 %vm2166_vm2, %v2165_v11  ;;  %v506_v13 = vld [vmem:[%s2323_s9 + $0x8] sm:$0xff]  ;;  %v505_v14 = vld [vmem:[%s2323_s9] sm:$0xff]  ;;  %s2167_s0 = smov 104   ;;  %s2168_s1 = smov 120   ;;  %vm591_vm3 = vcmask 64512   ;;  %vm1255_vm4 = vcmask 130048  }
  0x31   : > { %1856 = vmatpush3.msra.mxu1 %v508_v10  ;;  %1876 = vmatprep.subr.mxu0 %v2165_v11  ;;  %v2367_v19 = vshrl.u32 %v495_v18, 7  ;;  %v2371_v21 = vld [vmem:[%s2318_s22] sm:$0x3f]  ;;  %s2169_s9 = smov 112   ;;  %s2170_s14 = smov 96   ;;  %vm1257_vm5 = vcmask 195584  }
  0x32   : > { %1857 = vmatprep.subr.mxu1 %v2165_v11  ;;  %1878 = vmatprep.mubr.msk.f32.mxu0 %vm2166_vm2, %v2165_v11  ;;  %s2171_s15 = smov 64   ;;  %s2172_s21 = smov 8  }
  0x33   : > { %1858 = vmatpush3.msra.mxu1 %v507_v12  ;;  %v497_v20 = vsub.s32 0, %v2367_v19  ;;  %v502_v22 = vsub.s32 1, %v2367_v19  ;;  %s2173_s22 = smov 16   ;;  %s2174_s24 = smov 24  }
  0x34   : > { %1859 = vmatprep.subr.mxu1 %v2165_v11  ;;  %p1796_p1 = scmp.ne.s32.totalorder %s2147_s12, 3 }
  0x35   : > { %v477_v1 = vld [vmem:[#allocation2] sm:$0xff]  ;;  %1860 = vmatpush3.msra.mxu1 %v506_v13  ;;  %v498_v23 = vrot.slane %v2371_v21, %v497_v20  ;;  %v503_v26 = vrot.slane %v2371_v21, %v502_v22 }
  0x36   : > { %v2347_v3 = vadd.f32 %v478_v2, %v477_v1  ;;  %1861 = vmatprep.subr.mxu1 %v2165_v11 }
  0x37   : > { %1862 = vmatpush3.msra.mxu1 %v505_v14 }
  0x38   : > { %v481_v4 = vsel %vm480_vm1, %v2347_v3, 0.0  ;;  %1866 = vmatprep.subr.mxu1 %v2165_v11 }
  0x39   : > { %482 = vadd.xlane.f32.xlu0 %v481_v4 }
  0xc2   : > { %v483_v5 = vpop.xlane.xlu0 %482 }
  0xc3   : > { %v485_v6 = vmul.f32 0.03125, %v483_v5 }
  0xc5   : > { %v486_v7 = vsub.f32 %v2347_v3, %v485_v6 }
  0xc7   : > { %v487_v8 = vmul.f32 %v486_v7, %v486_v7 }
  0xc9   : > { %v488_v9 = vsel %vm480_vm1, %v487_v8, 0.0 }
  0xca   : > { %489 = vadd.xlane.f32.xlu0 %v488_v9 }
 0x153   : > { %v490_v15 = vpop.xlane.xlu0 %489 }
 0x154   : > { %v491_v16 = vmul.f32 0.03125, %v490_v15 }
 0x156   : > { %v492_v17 = vadd.f32 1e-05, %v491_v16 }
 0x158   : > { %2045 = vrsqrt.f32 %v492_v17 }
 0x165   : > { %v2046_v24 = vpop.eup %2045 }
 0x166   : > { %v494_v25 = vmul.f32 %v2046_v24, %v486_v7 }
 0x168   : > { %v499_v27 = vmul.f32 %v498_v23, %v494_v25 }
 0x16a   : > { %v504_v28 = vadd.f32 %v503_v26, %v499_v27 }
 0x16c   : > { %1864 = vmatmul.mubr.msk.f32.vlgmr.msra.gmra.mxu1 %vm480_vm1, %v504_v28  ;;  %v1262_v28 = vld [vmem:[%s2328_s18 + $0x18] sm:$0xff] }
 0x16d   : > { %1868 = vmatprep.mubr.msk.f32.mxu1 %vm2166_vm2, %v2165_v11 }
 0x22c   : > { %v578_v29 = vpop.f32.mrf.mxu1 }
 0x22d   : > { %587 = vrot.lane.b32.xlu0 %v578_v29, %s2167_s0  ;;  %583 = vrot.lane.b32.xlu1 %v578_v29, %s2168_s1 }
 0x22e   : > { %v1865_v30 = vpop.f32.mrf.mxu1 }
 0x22f   : > { %v1260_v30 = vld [vmem:[%s2328_s18 + $0x8] sm:$0xff] }
 0x231   : > { %585 = vrot.lane.b32.xlu1 %v578_v29, %s2169_s9 }
 0x235   : > { %589 = vrot.lane.b32.xlu1 %v578_v29, %s2170_s14 }
 0x29f   : > { %v2379_v31 = vpop.permute.xlu1 %583  ;;  %v2385_v33 = vpop.permute.xlu0 %587 }
 0x2a0   : > { %666 = vrot.lane.b32.xlu1 %v2379_v31, %s2170_s14 }
 0x2a3   : > { %v2382_v32 = vpop.permute.xlu1 %585 }
 0x2a4   : > { %742 = vrot.lane.b32.xlu1 %v2382_v32, %s2170_s14 }
 0x2a7   : > { %v590_v34 = vpop.permute.xlu1 %589 }
 0x2a8   : > { %818 = vrot.lane.b32.xlu1 %v2385_v33, %s2170_s14  ;;  %1867 = vmatpush3.xpose.msk.msra.mxu1 %vm591_vm3, %v590_v34 }
 0x2a9   : > { %1871 = vmatprep.subr.mxu1 %v2165_v11 }
 0x2ab   : > { %1869 = vmatmul.mubr.msk.f32.vlgmr.msra.gmra.mxu1 %vm591_vm3, %v578_v29 }
 0x2ac   : > { %1873 = vmatprep.mubr.msk.f32.mxu1 %vm2166_vm2, %v2165_v11 }
 0x312   : > { %v667_v35 = vpop.permute.xlu1 %666 }
 0x313   : > { %1872 = vmatpush3.xpose.msk.msra.mxu1 %vm591_vm3, %v667_v35 }
 0x314   : > { %1881 = vmatprep.subr.mxu1 %v2165_v11 }
 0x316   : > { %1874 = vmatmul.mubr.msk.f32.vlgmr.msra.gmra.mxu1 %vm591_vm3, %v2379_v31  ;;  %v743_v36 = vpop.permute.xlu1 %742 }
 0x317   : > { %1877 = vmatpush3.xpose.msk.msra.mxu0 %vm591_vm3, %v743_v36  ;;  %1883 = vmatprep.mubr.msk.f32.mxu1 %vm2166_vm2, %v2165_v11 }
 0x318   : > { %1886 = vmatprep.subr.mxu0 %v2165_v11 }
 0x31a   : > { %1879 = vmatmul.mubr.msk.f32.vlgmr.msra.gmra.mxu0 %vm591_vm3, %v2382_v32  ;;  %v819_v37 = vpop.permute.xlu1 %818 }
 0x31b   : > { %1882 = vmatpush3.xpose.msk.msra.mxu1 %vm591_vm3, %v819_v37  ;;  %1888 = vmatprep.mubr.msk.f32.mxu0 %vm2166_vm2, %v2165_v11 }
 0x31c   : > { %1891 = vmatprep.subr.mxu1 %v2165_v11 }
 0x31e   : > { %1884 = vmatmul.mubr.msk.f32.vlgmr.msra.gmra.mxu1 %vm591_vm3, %v2385_v33 }
 0x31f   : > { %1893 = vmatprep.mubr.msk.f32.mxu1 %vm2166_vm2, %v2165_v11 }
 0x36b   : > { %v662_v38 = vpop.f32.mrf.mxu1 }
 0x36c   : > { %v894_v39 = vsel %vm591_vm3, %v662_v38, -inf }
 0x36d   : > { %895 = vmax.xlane.f32.xlu1 %v894_v39  ;;  %v1870_v40 = vpop.f32.mrf.mxu1 }
 0x3d6   : > { %v738_v41 = vpop.f32.mrf.mxu1 }
 0x3d7   : > { %v897_v42 = vsel %vm591_vm3, %v738_v41, -inf }
 0x3d8   : > { %898 = vmax.xlane.f32.xlu0 %v897_v42  ;;  %v1875_v43 = vpop.f32.mrf.mxu1 }
 0x3da   : > { %v814_v44 = vpop.f32.mrf.mxu0 }
 0x3db   : > { %v900_v45 = vsel %vm591_vm3, %v814_v44, -inf }
 0x3dc   : > { %v1880_v46 = vpop.f32.mrf.mxu0  ;;  %901 = vmax.xlane.f32.xlu1 %v900_v45 }
 0x3de   : > { %v890_v47 = vpop.f32.mrf.mxu1 }
 0x3df   : > { %v903_v48 = vsel %vm591_vm3, %v890_v47, -inf }
 0x3e0   : > { %904 = vmax.xlane.f32.xlu0 %v903_v48  ;;  %v1885_v49 = vpop.f32.mrf.mxu1 }
 0x3ed   : > { %938 = vrot.lane.b32.xlu1 %v578_v29, %s2171_s15  ;;  %v1261_v29 = vld [vmem:[%s2328_s18 + $0x10] sm:$0xff] }
 0x3f6   : > { %v896_v50 = vpop.xlane.xlu1 %895 }
 0x3f7   : > { %v906_v51 = vsub.f32 %v662_v38, %v896_v50 }
 0x3f9   : > { %v910_v52 = vmul.f32 1.442695, %v906_v51 }
 0x3fb   : > { %2047 = vpow2.f32 %v910_v52 }
 0x408   : > { %v2048_v53 = vpop.eup %2047 }
 0x409   : > { %v918_v54 = vsel %vm591_vm3, %v2048_v53, 0.0 }
 0x411   : > { %919 = vadd.xlane.f32.xlu1 %v918_v54 }
 0x461   : > { %v899_v55 = vpop.xlane.xlu0 %898 }
 0x462   : > { %v907_v56 = vsub.f32 %v738_v41, %v899_v55 }
 0x464   : > { %v912_v57 = vmul.f32 1.442695, %v907_v56  ;;  %v1367_v56 = vld [vmem:[%s2333_s20 + $0x18] sm:$0xff] }
 0x465   : > { %v902_v58 = vpop.xlane.xlu1 %901 }
 0x466   : > { %2049 = vpow2.f32 %v912_v57  ;;  %v908_v59 = vsub.f32 %v814_v44, %v902_v58  ;;  %v1265_v44 = vsub.s32 2, %v2367_v19  ;;  %v1366_v57 = vld [vmem:[%s2333_s20 + $0x10] sm:$0xff]  ;;  %v1364_v58 = vld [vmem:[%s2333_s20] sm:$0xff] }
 0x468   : > { %v914_v60 = vmul.f32 1.442695, %v908_v59  ;;  %v1266_v45 = vrot.slane %v2371_v21, %v1265_v44 }
 0x469   : > { %v939_v61 = vpop.permute.xlu1 %938  ;;  %v905_v62 = vpop.xlane.xlu0 %904 }
 0x46a   : > { %2051 = vpow2.f32 %v914_v60  ;;  %v909_v63 = vsub.f32 %v890_v47, %v905_v62  ;;  %1887 = vmatpush3.msra.mxu0 %v939_v61  ;;  %v1356_v62 = vsub.s32 3, %v2367_v19 }
 0x46b   : > { %1896 = vmatprep.subr.mxu0 %v2165_v11 }
 0x46c   : > { %v916_v0 = vmul.f32 1.442695, %v909_v63  ;;  %v1361_v63 = vsub.s32 4, %v2367_v19 }
 0x46e   : > { %2053 = vpow2.f32 %v916_v0  ;;  %v1357_v0 = vrot.slane %v2371_v21, %v1356_v62 }
 0x473   : > { %v2050_v1 = vpop.eup %2049 }
 0x474   : > { %v921_v2 = vsel %vm591_vm3, %v2050_v1, 0.0 }
 0x475   : > { %922 = vadd.xlane.f32.xlu0 %v921_v2 }
 0x477   : > { %v2052_v4 = vpop.eup %2051 }
 0x478   : > { %v924_v5 = vsel %vm591_vm3, %v2052_v4, 0.0 }
 0x479   : > { %925 = vadd.xlane.f32.xlu1 %v924_v5 }
 0x47b   : > { %v2054_v6 = vpop.eup %2053 }
 0x47c   : > { %v927_v7 = vsel %vm591_vm3, %v2054_v6, 0.0 }
 0x47d   : > { %928 = vadd.xlane.f32.xlu0 %v927_v7  ;;  %v1489_v7 = vld [vmem:[%s2343_s30 + $0x78] sm:$0xff] }
 0x48a   : > { %1090 = vrot.lane.b32.xlu1 %v2382_v32, %s2171_s15 }
 0x48e   : > { %1166 = vrot.lane.b32.xlu1 %v2385_v33, %s2171_s15 }
 0x493   : > { %1014 = vrot.lane.b32.xlu0 %v2379_v31, %s2171_s15  ;;  %v1259_v31 = vld [vmem:[%s2328_s18] sm:$0xff] }
 0x49a   : > { %v920_v8 = vpop.xlane.xlu1 %919 }
 0x49b   : > { %2055 = vrcp.f32 %v920_v8  ;;  %v1488_v8 = vld [vmem:[%s2343_s30 + $0x70] sm:$0xff] }
 0x4a8   : > { %v2056_v9 = vpop.eup %2055 }
 0x4a9   : > { %v931_v10 = vmul.f32 %v2056_v9, %v2048_v53  ;;  %v1487_v9 = vld [vmem:[%s2343_s30 + $0x68] sm:$0xff] }
 0x4ab   : > { %1889 = vmatmul.mubr.msk.f32.vlgmr.msra.gmra.mxu0 %vm591_vm3, %v931_v10  ;;  %v1486_v10 = vld [vmem:[%s2343_s30 + $0x60] sm:$0xff] }
 0x4ac   : > { %1898 = vmatprep.mubr.msk.f32.mxu0 %vm2166_vm2, %v2165_v11 }
 0x4fe   : > { %v923_v12 = vpop.xlane.xlu0 %922 }
 0x4ff   : > { %2057 = vrcp.f32 %v923_v12  ;;  %v1485_v12 = vld [vmem:[%s2343_s30 + $0x58] sm:$0xff] }
 0x502   : > { %v926_v13 = vpop.xlane.xlu1 %925 }
 0x503   : > { %2059 = vrcp.f32 %v926_v13  ;;  %v1484_v13 = vld [vmem:[%s2343_s30 + $0x50] sm:$0xff] }
 0x506   : > { %v1091_v14 = vpop.permute.xlu1 %1090  ;;  %v929_v15 = vpop.xlane.xlu0 %928 }
 0x507   : > { %2061 = vrcp.f32 %v929_v15  ;;  %1897 = vmatpush3.msra.mxu0 %v1091_v14  ;;  %v1483_v14 = vld [vmem:[%s2343_s30 + $0x48] sm:$0xff]  ;;  %v1482_v15 = vld [vmem:[%s2343_s30 + $0x40] sm:$0xff] }
 0x508   : > { %1928 = vmatprep.subr.mxu0 %v2165_v11 }
 0x50a   : > { %v1015_v16 = vpop.permute.xlu0 %1014  ;;  %v1167_v20 = vpop.permute.xlu1 %1166 }
 0x50b   : > { %1892 = vmatpush3.msra.mxu1 %v1015_v16  ;;  %v1481_v16 = vld [vmem:[%s2343_s30 + $0x38] sm:$0xff] }
 0x50c   : > { %v2058_v17 = vpop.eup %2057  ;;  %1901 = vmatprep.subr.mxu1 %v2165_v11 }
 0x50d   : > { %v933_v18 = vmul.f32 %v2058_v17, %v2050_v1  ;;  %v1480_v17 = vld [vmem:[%s2343_s30 + $0x30] sm:$0xff] }
 0x50f   : > { %1894 = vmatmul.mubr.msk.f32.vlgmr.msra.gmra.mxu1 %vm591_vm3, %v933_v18  ;;  %v1479_v18 = vld [vmem:[%s2343_s30 + $0x28] sm:$0xff] }
 0x510   : > { %v2060_v22 = vpop.eup %2059  ;;  %1902 = vmatpush3.msra.mxu1 %v1167_v20  ;;  %1903 = vmatprep.mubr.msk.f32.mxu1 %vm2166_vm2, %v2165_v11  ;;  %v1478_v20 = vld [vmem:[%s2343_s30 + $0x20] sm:$0xff] }
 0x511   : > { %v935_v23 = vmul.f32 %v2060_v22, %v2052_v4  ;;  %1906 = vmatprep.subr.mxu1 %v2165_v11  ;;  %v1362_v4 = vrot.slane %v2371_v21, %v1361_v63  ;;  %v1477_v22 = vld [vmem:[%s2343_s30 + $0x18] sm:$0xff] }
 0x513   : > { %1899 = vmatmul.mubr.msk.f32.vlgmr.msra.gmra.mxu0 %vm591_vm3, %v935_v23  ;;  %v1476_v23 = vld [vmem:[%s2343_s30 + $0x10] sm:$0xff] }
 0x514   : > { %v2062_v24 = vpop.eup %2061  ;;  %1960 = vmatprep.mubr.msk.f32.mxu0 %vm2166_vm2, %v2165_v11  ;;  %1929 = vmatpush3.msra.mxu0 %v1489_v7 }
 0x515   : > { %v937_v25 = vmul.f32 %v2062_v24, %v2054_v6  ;;  %1930 = vmatprep.subr.mxu0 %v2165_v11  ;;  %v1475_v24 = vld [vmem:[%s2343_s30 + $0x8] sm:$0xff] }
 0x516   : > { %1931 = vmatpush3.msra.mxu0 %v1488_v8 }
 0x517   : > { %1904 = vmatmul.mubr.msk.f32.vlgmr.msra.gmra.mxu1 %vm591_vm3, %v937_v25  ;;  %1932 = vmatprep.subr.mxu0 %v2165_v11  ;;  %v1474_v25 = vld [vmem:[%s2343_s30] sm:$0xff] }
 0x518   : > { %1914 = vmatprep.mubr.msk.f32.mxu1 %vm2166_vm2, %v2165_v11  ;;  %1907 = vmatpush3.msra.mxu1 %v1262_v28 }
 0x519   : > { %1908 = vmatprep.subr.mxu1 %v2165_v11  ;;  %1933 = vmatpush3.msra.mxu0 %v1487_v9 }
 0x51a   : > { %1909 = vmatpush3.msra.mxu1 %v1261_v29  ;;  %1934 = vmatprep.subr.mxu0 %v2165_v11 }
 0x51b   : > { %1910 = vmatprep.subr.mxu1 %v2165_v11  ;;  %1935 = vmatpush3.msra.mxu0 %v1486_v10 }
 0x51c   : > { %1911 = vmatpush3.msra.mxu1 %v1260_v30  ;;  %1936 = vmatprep.subr.mxu0 %v2165_v11 }
 0x51d   : > { %1912 = vmatprep.subr.mxu1 %v2165_v11  ;;  %1937 = vmatpush3.msra.mxu0 %v1485_v12 }
 0x51e   : > { %1913 = vmatpush3.msra.mxu1 %v1259_v31  ;;  %1938 = vmatprep.subr.mxu0 %v2165_v11 }
 0x51f   : > { %1917 = vmatprep.subr.mxu1 %v2165_v11  ;;  %1939 = vmatpush3.msra.mxu0 %v1484_v13 }
 0x520   : > { %1940 = vmatprep.subr.mxu0 %v2165_v11 }
 0x521   : > { %1941 = vmatpush3.msra.mxu0 %v1483_v14 }
 0x522   : > { %1942 = vmatprep.subr.mxu0 %v2165_v11 }
 0x523   : > { %1943 = vmatpush3.msra.mxu0 %v1482_v15 }
 0x524   : > { %1944 = vmatprep.subr.mxu0 %v2165_v11 }
 0x525   : > { %1945 = vmatpush3.msra.mxu0 %v1481_v16 }
 0x526   : > { %1946 = vmatprep.subr.mxu0 %v2165_v11 }
 0x527   : > { %1947 = vmatpush3.msra.mxu0 %v1480_v17 }
 0x528   : > { %1948 = vmatprep.subr.mxu0 %v2165_v11 }
 0x529   : > { %1949 = vmatpush3.msra.mxu0 %v1479_v18 }
 0x52a   : > { %1950 = vmatprep.subr.mxu0 %v2165_v11 }
 0x52b   : > { %1951 = vmatpush3.msra.mxu0 %v1478_v20 }
 0x52c   : > { %1952 = vmatprep.subr.mxu0 %v2165_v11 }
 0x52d   : > { %1953 = vmatpush3.msra.mxu0 %v1477_v22 }
 0x52e   : > { %1954 = vmatprep.subr.mxu0 %v2165_v11 }
 0x52f   : > { %1955 = vmatpush3.msra.mxu0 %v1476_v23 }
 0x530   : > { %1956 = vmatprep.subr.mxu0 %v2165_v11 }
 0x531   : > { %1957 = vmatpush3.msra.mxu0 %v1475_v24 }
 0x532   : > { %1958 = vmatprep.subr.mxu0 %v2165_v11 }
 0x533   : > { %1959 = vmatpush3.msra.mxu0 %v1474_v25 }
 0x56b   : > { %v1010_v26 = vpop.f32.mrf.mxu0 }
 0x56d   : > { %v1890_v27 = vpop.f32.mrf.mxu0 }
 0x5cf   : > { %v1086_v32 = vpop.f32.mrf.mxu1 }
 0x5d0   : > { %1243 = vrot.lane.b32.xlu0 %v1086_v32, %s2172_s21 }
 0x5d1   : > { %v1895_v33 = vpop.f32.mrf.mxu1 }
 0x5d3   : > { %v1162_v34 = vpop.f32.mrf.mxu0 }
 0x5d4   : > { %1247 = vrot.lane.b32.xlu1 %v1162_v34, %s2173_s22 }
 0x5d5   : > { %v1900_v35 = vpop.f32.mrf.mxu0 }
 0x5d7   : > { %v1238_v36 = vpop.f32.mrf.mxu1 }
 0x5d8   : > { %1251 = vrot.lane.b32.xlu0 %v1238_v36, %s2174_s24 }
 0x5d9   : > { %v1905_v37 = vpop.f32.mrf.mxu1 }
 0x642   : > { %v1244_v38 = vpop.permute.xlu0 %1243 }
 0x643   : > { %v1254_v40 = vsel %vm591_vm3, %v1010_v26, %v1244_v38  ;;  %v1794_v26 = vld [vmem:[%s462_s11] ss:$0 sm:$0xff] }
 0x646   : > { %v1248_v39 = vpop.permute.xlu1 %1247 }
 0x647   : > { %v1256_v41 = vsel %vm1255_vm4, %v1254_v40, %v1248_v39 }
 0x64a   : > { %v1252_v42 = vpop.permute.xlu0 %1251 }
 0x64b   : > { %v1258_v43 = vsel %vm1257_vm5, %v1256_v41, %v1252_v42 }
 0x64c   : > { %1915 = vmatmul.mubr.msk.f32.vlgmr.msra.gmra.mxu1 %vm480_vm1, %v1258_v43 }
 0x64d   : > { %1925 = vmatprep.mubr.msk.f32.mxu1 %vm2166_vm2, %v2165_v11  ;;  %1918 = vmatpush3.msra.mxu1 %v1367_v56  ;;  %v1492_v56 = vsub.s32 5, %v2367_v19 }
 0x64e   : > { %1919 = vmatprep.subr.mxu1 %v2165_v11 }
 0x64f   : > { %1920 = vmatpush3.msra.mxu1 %v1366_v57  ;;  %v1493_v57 = vrot.slane %v2371_v21, %v1492_v56 }
 0x650   : > { %1921 = vmatprep.subr.mxu1 %v2165_v11 }
 0x70c   : > { %v1336_v46 = vpop.f32.mrf.mxu1 }
 0x70d   : > { %v1337_v47 = vadd.f32 %v1336_v46, %v1266_v45 }
 0x70e   : > { %v1916_v48 = vpop.f32.mrf.mxu1 }
 0x70f   : > { %v2457_v49 = vadd.f32 %v1337_v47, %v2347_v3  ;;  %v1365_v3 = vld [vmem:[%s2333_s20 + $0x8] sm:$0xff] }
 0x710   : > { %1922 = vmatpush3.msra.mxu1 %v1365_v3 }
 0x711   : > { %v1341_v50 = vsel %vm480_vm1, %v2457_v49, 0.0  ;;  %1923 = vmatprep.subr.mxu1 %v2165_v11 }
 0x712   : > { %1342 = vadd.xlane.f32.xlu1 %v1341_v50  ;;  %1924 = vmatpush3.msra.mxu1 %v1364_v58  ;;  %v2175_v50 = vmov -1.0  }
 0x79b   : > { %v1343_v51 = vpop.xlane.xlu1 %1342 }
 0x79c   : > { %v1344_v52 = vmul.f32 0.03125, %v1343_v51 }
 0x79e   : > { %v1345_v53 = vsub.f32 %v2457_v49, %v1344_v52 }
 0x7a0   : > { %v1346_v54 = vmul.f32 %v1345_v53, %v1345_v53 }
 0x7a2   : > { %v1347_v55 = vsel %vm480_vm1, %v1346_v54, 0.0 }
 0x7a3   : > { %1348 = vadd.xlane.f32.xlu0 %v1347_v55 }
 0x82c   : > { %v1349_v59 = vpop.xlane.xlu0 %1348 }
 0x82d   : > { %v1350_v60 = vmul.f32 0.03125, %v1349_v59 }
 0x82f   : > { %v1351_v61 = vadd.f32 1e-05, %v1350_v60 }
 0x831   : > { %2063 = vrsqrt.f32 %v1351_v61 }
 0x83e   : > { %v2064_v1 = vpop.eup %2063 }
 0x83f   : > { %v1353_v2 = vmul.f32 %v2064_v1, %v1345_v53 }
 0x841   : > { %v1358_v5 = vmul.f32 %v1357_v0, %v1353_v2 }
 0x843   : > { %v1363_v6 = vadd.f32 %v1362_v4, %v1358_v5 }
 0x845   : > { %1926 = vmatmul.mubr.msk.f32.vlgmr.msra.gmra.mxu1 %vm480_vm1, %v1363_v6 }
 0x905   : > { %v1443_v27 = vpop.f32.mrf.mxu1 }
 0x906   : > { %v1444_v28 = vadd.f32 %v1794_v26, %v1443_v27 }
 0x907   : > { %v1927_v29 = vpop.f32.mrf.mxu1 }
 0x908   : > { %v1448_v30 = vmul.f32 0.70710677, %v1444_v28  ;;  %v1447_v53 = vmul.f32 0.5, %v1444_v28 }
 0x90a   : > { %v1451_v31 = vand.u32 2147483647, %v1448_v30  ;;  %vm1449_vm6 = vcmp.ge.f32.partialorder %v1448_v30, 0.0 }
 0x90b   : > { %v1450_v51 = vsel %vm1449_vm6, 1.0, %v2175_v50 }
 0x90c   : > { %v1452_v32 = vmul.f32 0.3275911, %v1451_v31  ;;  %v1465_v34 = vsub.f32 0.0, %v1451_v31 }
 0x90e   : > { %v1453_v33 = vadd.f32 1.0, %v1452_v32  ;;  %v1466_v35 = vmul.f32 %v1465_v34, %v1451_v31 }
 0x910   : > { %2065 = vrcp.f32 %v1453_v33  ;;  %v1467_v38 = vmul.f32 1.442695, %v1466_v35 }
 0x912   : > { %2067 = vpow2.f32 %v1467_v38 }
 0x91d   : > { %v2066_v36 = vpop.eup %2065 }
 0x91e   : > { %v1456_v37 = vmul.f32 1.0614054, %v2066_v36 }
 0x91f   : > { %v2068_v46 = vpop.eup %2067 }
 0x920   : > { %v1457_v11 = vadd.f32 -1.4531521, %v1456_v37 }
 0x922   : > { %v1458_v39 = vmul.f32 %v2066_v36, %v1457_v11 }
 0x924   : > { %v1459_v40 = vadd.f32 1.4214138, %v1458_v39 }
 0x926   : > { %v1460_v41 = vmul.f32 %v2066_v36, %v1459_v40 }
 0x928   : > { %v1461_v42 = vadd.f32 -0.28449672, %v1460_v41 }
 0x92a   : > { %v1462_v43 = vmul.f32 %v2066_v36, %v1461_v42 }
 0x92c   : > { %v1463_v44 = vadd.f32 0.2548296, %v1462_v43 }
 0x92e   : > { %v1464_v45 = vmul.f32 %v2066_v36, %v1463_v44 }
 0x930   : > { %v1469_v47 = vmul.f32 %v2068_v46, %v1464_v45 }
 0x932   : > { %v1470_v48 = vsub.f32 1.0, %v1469_v47 }
 0x934   : > { %v1471_v52 = vmul.f32 %v1470_v48, %v1450_v51 }
 0x936   : > { %v1472_v54 = vadd.f32 1.0, %v1471_v52 }
 0x938   : > { %v1473_v55 = vmul.f32 %v1472_v54, %v1447_v53 }
 0x93a   : > { %1961 = vmatmul.mubr.f32.vlgmr.msra.gmra.mxu0 %v1473_v55 }
 0x9fa   : > { %v1560_v3 = vpop.f32.mrf.mxu0 }
 0x9fb   : > { %v1561_v58 = vadd.f32 %v1560_v3, %v1493_v57  ;;  %1569 = sbr.rel (%p1796_p1) target bundleno = 2870 (0xb36), region = 64 }
 0x9fc   : > { %v1962_v59 = vpop.f32.mrf.mxu0 }
 0x9fd   : > { %v1564_v60 = vadd.f32 %v1561_v58, %v2457_v49 }
 0x9ff   : > { %1565 = vst.msk [vmem:[#allocation2] sm:$0xff] %vm480_vm1, %v1564_v60 }
 0xa00   : > { %vm1572_vm7 = vcmask 261124   ;;  %v1797_v5 = vld [vmem:[%s2583_s8] ss:$0 sm:$0xff]  ;;  %v1798_v7 = vld [vmem:[%s2583_s8 + $0x1] ss:$0 sm:$0xff] }
 0xa01   : > { %v1573_v61 = vsel %vm1572_vm7, %v1564_v60, 0.0 }
 0xa02   : > { %1574 = vadd.xlane.f32.xlu0 %v1573_v61 }
 0xa8b   : > { %v1575_v62 = vpop.xlane.xlu0 %1574 }
 0xa8c   : > { %v1576_v63 = vmul.f32 0.03125, %v1575_v62 }
 0xa8e   : > { %v1577_v19 = vsub.f32 %v1564_v60, %v1576_v63 }
 0xa90   : > { %v1578_v0 = vmul.f32 %v1577_v19, %v1577_v19 }
 0xa92   : > { %v1579_v21 = vsel %vm1572_vm7, %v1578_v0, 0.0 }
 0xa93   : > { %1580 = vadd.xlane.f32.xlu0 %v1579_v21 }
 0xb1c   : > { %v1581_v1 = vpop.xlane.xlu0 %1580 }
 0xb1d   : > { %v1582_v2 = vmul.f32 0.03125, %v1581_v1 }
 0xb1f   : > { %v1583_v49 = vadd.f32 1e-05, %v1582_v2 }
 0xb21   : > { %2069 = vrsqrt.f32 %v1583_v49 }
 0xb2e   : > { %v2070_v4 = vpop.eup %2069 }
 0xb2f   : > { %v1585_v6 = vmul.f32 %v2070_v4, %v1577_v19 }
 0xb31   : > { %v1590_v8 = vmul.f32 %v1797_v5, %v1585_v6 }
 0xb33   : > { %v1595_v9 = vadd.f32 %v1798_v7, %v1590_v8 }
 0xb35   : > { %1596 = vst.msk [vmem:[%s432_s16 - $0x4] sm:$0xf0] %vm1572_vm7, %v1595_v9 }
 0xb36 PF: > { %s1800_s17 = sshll.u32 %s2151_s13, 6  ;;  %s2615_s26 = sld [smem:[#allocation18_spill]] }
 0xb37   : > { %s1611_s0 = sshll.u32 %s432_s16, 4  ;;  %s2616_s1 = sand.u32 1, %s2139_s10   ;;  %s1612_s0 = int_to_ptr.vmem [resolvable:$true] %s1611_s0 }
 0xb38   : > { %s1598_s9 = scalar_lea.sflag [#allocation4], %s2616_s1  ;;  %s2071_s14 = scalar_lea.vmem %s1612_s0, 64 }
 0xb39   : > { %p2072_p2 = scmp.ne.s32.totalorder %s1612_s0, %s2071_s14  ;;  %s2176_s15 = smov [#allocation3]  }
 0xb3a   : > { %s2075_s21 = sshll.u32 %s2176_s15, 4  ;;  %s2076_s21 = int_to_ptr.vmem [resolvable:$false] %s2075_s21 }
 0xb3b   : > { %p2073_p4 = pnand %p2072_p2, %p2276_p3  ;;  %s2077_s22 = scalar_lea.vmem %s2076_s21, 128 }
 0xb3c   : > { %s1609_s30 = scalar_lea.hbm %s2615_s26, %s1800_s17  ;;  %p2078_p6 = scmp.lt.s32.totalorder %s1612_s0, %s2076_s21 }
 0xb3d   : > { %p2074_p5 = pneg %p2073_p4  ;;  %p2079_p7 = scmp.lt.s32.totalorder %s2077_s22, %s2071_s14 }
 0xb3f   : > { %p2080_p8 = por %p2079_p7, %p2078_p6 }
 0xb41   : > { %p2081_p10 = pnand %p2080_p8, %p2074_p5 }
 0xb43   : > { %2084 = shalt.err (!%p2081_p10)
}
 0xb44   : > { %s2085_s13 = scalar_lea.hbm %s1609_s30, 64  ;;  %s2089_s24 = scalar_lea.hbm %s2615_s26, 128 }
 0xb45   : > { %p2086_p11 = scmp.ne.s32.totalorder %s1609_s30, %s2085_s13  ;;  %p2090_p0 = scmp.lt.s32.totalorder %s1609_s30, %s2615_s26 }
 0xb46   : > { %p2091_p1 = scmp.lt.s32.totalorder %s2089_s24, %s2085_s13 }
 0xb47   : > { %p2087_p12 = pnand %p2086_p11, %p2276_p3 }
 0xb48   : > { %p2092_p2 = por %p2091_p1, %p2090_p0 }
 0xb49   : > { %p2088_p13 = pneg %p2087_p12 }
 0xb4b   : > { %p2093_p4 = pnand %p2092_p2, %p2088_p13 }
 0xb4d   : > { %2096 = shalt.err (!%p2093_p4)
}
 0xb4e   : > { %1963 = dma.vmem_to_hbm [thread:$0]  (%p2276_p3), %s1612_s0, 64, %s1609_s30, %s1598_s9  }
 0xb4f PF: > { %s2617_s29 = sld [smem:[#allocation10_spill]] }
 0xb50   : > { %s2618_s12 = sld [smem:[#allocation6_spill]] }
 0xb55   : > { %p1969_p5 = scmp.ge.s32.totalorder %s2617_s29, 2 }
 0xb56   : > { %s1623_s19 = sand.u32 1, %s2618_s12  }
 0xb57   : > { %p1966_p6 = pnand %p1969_p5, %p2286_p9  ;;  %s1624_s17 = scalar_lea.sflag [#allocation4], %s1623_s19 }
 0xb59   : > { %p1967_p7 = pneg %p1966_p6 }
 0xb5b   : > { %2130 = dma.done.wait (%p1967_p7), %s1624_s17, 64  }
 0xb5c   : > { %2132 = vsyncadd (%p1967_p7), %s1624_s17, 4294967232  ;;  %s22_s16 = sadd.s32 1, %s2617_s29   ;;  %s2620_s11 = sld [smem:[#allocation7_spill]] }
 0xb5d   : > { %p19_p8 = scmp.ge.s32.totalorder %s22_s16, 10   ;;  %s2621_s25 = sld [smem:[#allocation15_spill]] }
 0xb5e   : > { %s2622_s12 = sld [smem:[#allocation8_spill]]  ;;  %s2626_s30 = smov %s2139_s10 }
 0xb5f   : > { %s2623_s13 = sld [smem:[#allocation9_spill]]  ;;  %21 = sbr.rel (!%p19_p8) target bundleno = 9 (0x9), region = 120 }
 0xb60   : > { %s2624_s14 = sld [smem:[#allocation11_spill]] }
 0xb61   : > { %s2625_s15 = sld [smem:[#allocation13_spill]] }
 0xb62   : > { %s2627_s10 = smov %s2620_s11 }
 0xb63   : > { %s2628_s11 = smov %s2621_s25 }
 0xb64   :  { %1629 = vsyncpa [#allocation4], 1 }
 0xb65   :  { %1631 = vsyncpa [#allocation4 + $0x1], 1 }

</bundles_post_ra>
